<compile_context>
chip_gen: v7x
topology: tpu7x:2x2x1
jax: 0.10.0
libtpu: 0.0.40
codegen_flags: <defaults>
</compile_context>

<pallas_src>
import jax
import jax.numpy as jnp
from jax.experimental import pallas as pl
from jax.experimental.pallas import tpu as pltpu


def _round_up(x, m):
    return (x + m - 1) // m * m


def _ffn_kernel(x_ref, w1t_ref, b1_ref, w2t_ref, b2_ref, o_ref):
    # x_ref: (tm, H) f32     w1t/w2t: (H, H) bf16 (grid-resident)     b: (1, H) f32
    x_f32 = x_ref[...]
    # bf16 cast for the MXU happens in-kernel (VPU work, hidden under DMA/MXU).
    h = jnp.dot(x_f32.astype(jnp.bfloat16), w1t_ref[...],
                preferred_element_type=jnp.float32) + b1_ref[...]
    h = jnp.maximum(h, 0.0)                      # ReLU (dropout1 = identity in eval)
    y = jnp.dot(h.astype(jnp.bfloat16), w2t_ref[...],
                preferred_element_type=jnp.float32) + b2_ref[...]
    # residual add against the true f32 input (dropout2 = identity in eval)
    o_ref[...] = (y + x_f32).astype(o_ref.dtype)


def pointwise_feedforward(x, w1, b1, w2, b2, *, tm=1024):
    """x: (B, L, H). w1, w2: (H, H, 1) Conv1d weights. b1, b2: (H,)."""
    B, L, H = x.shape
    N = B * L

    # ---- tile-size / VMEM budgeting (generation-safe: v7x has 64 MiB/TC) ----
    budget = 40 * 1024 * 1024
    weight_bytes = 2 * 2 * (H * H * 2)            # two bf16 weight mats, double-buffered
    # x + out pipeline buffers (double-buffered f32) + in-kernel f32 temporaries.
    per_row_bytes = (2 + 2 + 4) * H * 4
    tm = min(tm, max(8, (budget - weight_bytes) // per_row_bytes))
    tm = min(tm, _round_up(pl.cdiv(N, 2), 8))     # >= 2 grid steps (v7x megacore)
    tm = max(8, (tm // 8) * 8)
    grid = (pl.cdiv(N, tm),)

    vmem_need = weight_bytes + tm * per_row_bytes + (2 << 20)
    vmem_limit = int(min(48 * 1024 * 1024, max(32 * 1024 * 1024, vmem_need)))

    # Conv1d(k=1): out[o] = sum_i W[o, i, 0] * in[i] + b[o]  ->  x @ W[:, :, 0].T
    # Weights pre-transposed + cast to bf16 for the MXU (tiny arrays, negligible cost).
    # TODO(synk): for very large H (>~2K) add pipeline_mode=pl.Buffered(1) on the
    # constant weight/bias specs so they are not double-buffered in VMEM.
    w1t = jnp.transpose(w1[:, :, 0]).astype(jnp.bfloat16)
    w2t = jnp.transpose(w2[:, :, 0]).astype(jnp.bfloat16)
    b1r = b1.astype(jnp.float32).reshape(1, H)
    b2r = b2.astype(jnp.float32).reshape(1, H)

    x2d = x.reshape(N, H)                         # contiguous leading-dim merge: no copy

    flops = 4 * N * H * H                         # two matmuls, 2 flops/MAC
    bytes_accessed = (N * H * x.dtype.itemsize    # x read
                      + N * H * x.dtype.itemsize  # y write
                      + 2 * H * H * 2             # bf16 weights
                      + 2 * H * 4)                # biases

    out2d = pl.pallas_call(
        _ffn_kernel,
        out_shape=jax.ShapeDtypeStruct((N, H), x.dtype),
        grid_spec=pltpu.PrefetchScalarGridSpec(
            num_scalar_prefetch=0,
            grid=grid,
            in_specs=[
                pl.BlockSpec((tm, H), lambda i: (i, 0)),   # x rows (streamed)
                pl.BlockSpec((H, H), lambda i: (0, 0)),    # w1t (resident)
                pl.BlockSpec((1, H), lambda i: (0, 0)),    # b1
                pl.BlockSpec((H, H), lambda i: (0, 0)),    # w2t (resident)
                pl.BlockSpec((1, H), lambda i: (0, 0)),    # b2
            ],
            out_specs=pl.BlockSpec((tm, H), lambda i: (i, 0)),
        ),
        compiler_params=pltpu.CompilerParams(
            dimension_semantics=("parallel",),
            vmem_limit_bytes=vmem_limit,
        ),
        cost_estimate=pl.CostEstimate(
            flops=flops, transcendentals=0, bytes_accessed=bytes_accessed),
    )(x2d, w1t, b1r, w2t, b2r)

    return out2d.reshape(B, L, H)


def _reference_f32(x, w1, b1, w2, b2):
    # Pure-f32 reference of the PyTorch forward (dropout in eval mode).
    h = jnp.einsum("blh,oh->blo", x, w1[:, :, 0]) + b1
    h = jnp.maximum(h, 0.0)
    y = jnp.einsum("blh,oh->blo", h, w2[:, :, 0]) + b2
    return y + x


def _reference_matched(x, w1, b1, w2, b2):
    # Numerically matched reference: bf16 MXU operands, f32 accumulation,
    # f32 residual (same recipe as the kernel).
    xb = x.astype(jnp.bfloat16)
    w1b = jnp.transpose(w1[:, :, 0]).astype(jnp.bfloat16)
    w2b = jnp.transpose(w2[:, :, 0]).astype(jnp.bfloat16)
    h = jnp.einsum("blh,ho->blo", xb, w1b,
                   preferred_element_type=jnp.float32) + b1.astype(jnp.float32)
    h = jnp.maximum(h, 0.0)
    y = jnp.einsum("blh,ho->blo", h.astype(jnp.bfloat16), w2b,
                   preferred_element_type=jnp.float32) + b2.astype(jnp.float32)
    return y + x


if __name__ == "__main__":
    B, L, H = 2, 64, 32     # batch=2, seq=64, hidden_units=32
    key = jax.random.PRNGKey(0)
    kx, k1, k2, k3, k4 = jax.random.split(key, 5)

    x = jax.random.normal(kx, (B, L, H), dtype=jnp.float32)
    # Conv1d(hidden, hidden, kernel_size=1) parameter shapes: weight (H, H, 1), bias (H,)
    scale = 1.0 / jnp.sqrt(H)
    w1 = jax.random.uniform(k1, (H, H, 1), jnp.float32, -scale, scale)
    b1 = jax.random.uniform(k2, (H,), jnp.float32, -scale, scale)
    w2 = jax.random.uniform(k3, (H, H, 1), jnp.float32, -scale, scale)
    b2 = jax.random.uniform(k4, (H,), jnp.float32, -scale, scale)

    # TODO(synk): dropout layers are identity here (inference mode); training-mode
    # stochastic dropout would need pltpu.prng_seed/prng_random_bits in-kernel.

    out = jax.block_until_ready(pointwise_feedforward(x, w1, b1, w2, b2))
    assert out.shape == (B, L, H)
    assert out.dtype == x.dtype

    # Tight check vs a numerically matched (bf16-operand, f32-accumulate) reference.
    ref_m = _reference_matched(x, w1, b1, w2, b2)
    assert jnp.allclose(out, ref_m, atol=1e-3, rtol=1e-3), "mismatch vs matched reference"

    # Loose sanity check vs the full-f32 reference (bf16 operands cost ~1e-2 rel).
    ref_f32 = _reference_f32(x, w1, b1, w2, b2)
    assert jnp.allclose(out, ref_f32, atol=5e-2, rtol=5e-2), "mismatch vs f32 reference"

    print("KERNEL_OK")
</pallas_src>

<mosaic_0001>
module attributes {stable_mosaic.version = 11 : i64} {
  func.func @_ffn_kernel(%arg0: i32, %arg1: memref<64x32xf32, #tpu.memory_space<vmem>>, %arg2: memref<32x32xbf16, #tpu.memory_space<vmem>>, %arg3: memref<1x32xf32, #tpu.memory_space<vmem>>, %arg4: memref<32x32xbf16, #tpu.memory_space<vmem>>, %arg5: memref<1x32xf32, #tpu.memory_space<vmem>>, %arg6: memref<64x32xf32, #tpu.memory_space<vmem>>) attributes {dimension_semantics = [#tpu.dimension_semantics<parallel>], iteration_bounds = array<i64: 2>, scalar_prefetch = 0 : i64, scratch_operands = 0 : i64, tpu.core_type = #tpu.core_type<tc>, window_params = [{transform_indices = @transform_0, window_bounds = array<i64: 64, 32>}, {pipeline_mode = #tpu.pipeline_mode<synchronous>, transform_indices = @transform_1, window_bounds = array<i64: 32, 32>}, {pipeline_mode = #tpu.pipeline_mode<synchronous>, transform_indices = @transform_2, window_bounds = array<i64: 1, 32>}, {pipeline_mode = #tpu.pipeline_mode<synchronous>, transform_indices = @transform_3, window_bounds = array<i64: 32, 32>}, {pipeline_mode = #tpu.pipeline_mode<synchronous>, transform_indices = @transform_4, window_bounds = array<i64: 1, 32>}, {transform_indices = @transform_5, window_bounds = array<i64: 64, 32>}]} {
    %c0 = arith.constant 0 : index
    %c0_0 = arith.constant 0 : index
    %0 = vector.load %arg1[%c0, %c0_0] : memref<64x32xf32, #tpu.memory_space<vmem>>, vector<64x32xf32>
    %1 = arith.truncf %0 : vector<64x32xf32> to vector<64x32xbf16>
    %c0_1 = arith.constant 0 : index
    %c0_2 = arith.constant 0 : index
    %2 = vector.load %arg2[%c0_1, %c0_2] : memref<32x32xbf16, #tpu.memory_space<vmem>>, vector<32x32xbf16>
    %cst = arith.constant dense<0.000000e+00> : vector<64x32xf32>
    %3 = tpu.matmul %1, %2, %cst {dimension_numbers = #tpu.dot_dimension_numbers<[1], [0], [0], [1], [0, 0, 1, 1], [], []>} : vector<64x32xbf16>, vector<32x32xbf16>, vector<64x32xf32> -> vector<64x32xf32>
    %c0_3 = arith.constant 0 : index
    %c0_4 = arith.constant 0 : index
    %4 = vector.load %arg3[%c0_3, %c0_4] : memref<1x32xf32, #tpu.memory_space<vmem>>, vector<1x32xf32>
    %5 = vector.broadcast %4 : vector<1x32xf32> to vector<64x32xf32>
    %6 = arith.addf %3, %5 : vector<64x32xf32>
    %cst_5 = arith.constant 0.000000e+00 : f32
    %7 = vector.broadcast %cst_5 : f32 to vector<64x32xf32>
    %8 = arith.maximumf %6, %7 : vector<64x32xf32>
    %9 = arith.truncf %8 : vector<64x32xf32> to vector<64x32xbf16>
    %c0_6 = arith.constant 0 : index
    %c0_7 = arith.constant 0 : index
    %10 = vector.load %arg4[%c0_6, %c0_7] : memref<32x32xbf16, #tpu.memory_space<vmem>>, vector<32x32xbf16>
    %cst_8 = arith.constant dense<0.000000e+00> : vector<64x32xf32>
    %11 = tpu.matmul %9, %10, %cst_8 {dimension_numbers = #tpu.dot_dimension_numbers<[1], [0], [0], [1], [0, 0, 1, 1], [], []>} : vector<64x32xbf16>, vector<32x32xbf16>, vector<64x32xf32> -> vector<64x32xf32>
    %c0_9 = arith.constant 0 : index
    %c0_10 = arith.constant 0 : index
    %12 = vector.load %arg5[%c0_9, %c0_10] : memref<1x32xf32, #tpu.memory_space<vmem>>, vector<1x32xf32>
    %13 = vector.broadcast %12 : vector<1x32xf32> to vector<64x32xf32>
    %14 = arith.addf %11, %13 : vector<64x32xf32>
    %15 = arith.addf %14, %0 : vector<64x32xf32>
    %c0_11 = arith.constant 0 : index
    %c0_12 = arith.constant 0 : index
    %16 = vector.load %arg6[%c0_11, %c0_12] : memref<64x32xf32, #tpu.memory_space<vmem>>, vector<64x32xf32>
    tpu.vector_store %arg6[%c0_11, %c0_12], %15 {strides = array<i32>} : memref<64x32xf32, #tpu.memory_space<vmem>>, vector<64x32xf32>,
    return
  }
  func.func @transform_0(%arg0: i32) -> (i32, i32) {
    %c0_i32 = arith.constant 0 : i32
    %c0_i32_0 = arith.constant 0 : i32
    return %arg0, %c0_i32 : i32, i32
  }
  func.func @transform_1(%arg0: i32) -> (i32, i32) {
    %c0_i32 = arith.constant 0 : i32
    %c0_i32_0 = arith.constant 0 : i32
    %c0_i32_1 = arith.constant 0 : i32
    return %c0_i32, %c0_i32_0 : i32, i32
  }
  func.func @transform_2(%arg0: i32) -> (i32, i32) {
    %c0_i32 = arith.constant 0 : i32
    %c0_i32_0 = arith.constant 0 : i32
    %c0_i32_1 = arith.constant 0 : i32
    return %c0_i32, %c0_i32_0 : i32, i32
  }
  func.func @transform_3(%arg0: i32) -> (i32, i32) {
    %c0_i32 = arith.constant 0 : i32
    %c0_i32_0 = arith.constant 0 : i32
    %c0_i32_1 = arith.constant 0 : i32
    return %c0_i32, %c0_i32_0 : i32, i32
  }
  func.func @transform_4(%arg0: i32) -> (i32, i32) {
    %c0_i32 = arith.constant 0 : i32
    %c0_i32_0 = arith.constant 0 : i32
    %c0_i32_1 = arith.constant 0 : i32
    return %c0_i32, %c0_i32_0 : i32, i32
  }
  func.func @transform_5(%arg0: i32) -> (i32, i32) {
    %c0_i32 = arith.constant 0 : i32
    %c0_i32_0 = arith.constant 0 : i32
    return %arg0, %c0_i32 : i32, i32
  }
}

</mosaic_0001>

<bundles_post_ra>
// kernel: tpu_custom_call.1
= control target key start
LH: loop header
LB: loop body
LE: loop exit
PB: predicated region body
PF: predicated region fallthrough
CT: control target
= control target key end

     0   :  { %s637_s18 = smov 0   ;;  %s723_s0 = inlined_call_operand.vmem [shape: f32[128,32], index: 0, kind: input, shape index: {}]   ;;  %s724_s1 = inlined_call_operand.vmem [shape: bf16[32,32], index: 1, kind: input, shape index: {}]   ;;  %s725_s2 = inlined_call_operand.vmem [shape: f32[1,32], index: 2, kind: input, shape index: {}]   ;;  %s726_s3 = inlined_call_operand.vmem [shape: bf16[32,32], index: 3, kind: input, shape index: {}]   ;;  %s727_s4 = inlined_call_operand.vmem [shape: f32[1,32], index: 4, kind: input, shape index: {}]   ;;  %s728_s5 = inlined_call_operand.vmem [shape: f32[128,32], index: 5, kind: output, shape index: {}]  }
   0x1 LB: > { %s526_s19 = sadd.s32 4294967295, %s605_s18   ;;  %p530_p0 = scmp.ge.s32.totalorder %s605_s18, 1  ;;  %s605_s18 = sphi %s637_s18, %s15_s18  }
   0x2   : > { %p188_p1 = scmp.lt.s32.totalorder %s605_s18, 3 }
   0x4   : > { %p189_p2 = pnand %p530_p0, %p188_p1 }
   0x5   : > { %v595_v0 = vld [vmem:[%s724_s1] sm:$0xff] (!%p189_p2)   ;;  %s531_s22 = sshll.u32 (!%p189_p2), %s526_s19, 3  ;;  %v596_v1 = vld [vmem:[%s724_s1 + $0x8] sm:$0xff] (!%p189_p2)   ;;  %vm264_vm0 = vcmask (!%p189_p2), 261120  }
   0x6   : > { %192 = sbr.rel (%p189_p2) target bundleno = 470 (0x1d6), region = 40  ;;  %p217_p3 = scmp.lt.s32.totalorder (!%p189_p2), %s531_s22, 15  ;;  %563 = vmatprep.subr.bf16.mxu0 (!%p189_p2), %v595_v0  ;;  %v597_v14 = vld [vmem:[%s726_s3] sm:$0xff] (!%p189_p2)   ;;  %v598_v15 = vld [vmem:[%s726_s3 + $0x8] sm:$0xff] (!%p189_p2)  }
   0x7   : > { %564 = vmatpush3.bf16.msra.mxu0 (!%p189_p2), %v595_v0  ;;  %575 = vmatprep.subr.bf16.mxu1 (!%p189_p2), %v597_v14  ;;  %v535_v16 = vld [vmem:[%s725_s2] ss:$0 sm:$0xff] (!%p189_p2) }
   0x8   : > { %565 = vmatprep.subr.bf16.mxu0 (!%p189_p2), %v596_v1  ;;  %576 = vmatpush3.bf16.msra.mxu1 (!%p189_p2), %v597_v14  ;;  %v542_v45 = vld [vmem:[%s727_s4] ss:$0 sm:$0xff] (!%p189_p2) }
   0x9   : > { %577 = vmatprep.subr.bf16.mxu1 (!%p189_p2), %v598_v15 }
   0xb   : > { %566 = vmatpush3.bf16.msra.mxu0 (!%p189_p2), %v596_v1 }
   0xc   : > { %578 = vmatpush3.bf16.msra.mxu1 (!%p189_p2), %v598_v15 }
   0xd   : > { %s730_s22 = smov (!%p217_p3, %s531_s22), 15 }
   0xe   : > { %s532_s25 = sshll.u32 %s730_s22, 3 }
   0xf   : > { %s220_s28 = scalar_lea.vmem %s723_s0, %s532_s25  ;;  %s226_s14 = scalar_lea.vmem %s728_s5, %s532_s25 }
  0x10   : > { %v659_v2 = vld [vmem:[%s220_s28] sm:$0xff]  ;;  %v661_v3 = vld [vmem:[%s220_s28 + $0x8] sm:$0xff]  ;;  %v231_v4 = vld [vmem:[%s220_s28 + $0x10] sm:$0xff] }
  0x11   : > { %v237_v5 = vpack.c.bf16 %v661_v3, %v659_v2  ;;  %v665_v6 = vld [vmem:[%s220_s28 + $0x18] sm:$0xff]  ;;  %v667_v7 = vld [vmem:[%s220_s28 + $0x20] sm:$0xff]  ;;  %v669_v8 = vld [vmem:[%s220_s28 + $0x28] sm:$0xff] }
  0x12   : > { %v238_v9 = vpack.c.bf16 %v665_v6, %v231_v4  ;;  %v239_v10 = vpack.c.bf16 %v669_v8, %v667_v7  ;;  %v677_v11 = vld [vmem:[%s220_s28 + $0x30] sm:$0xff]  ;;  %v679_v12 = vld [vmem:[%s220_s28 + $0x38] sm:$0xff] }
  0x13   : > { %567 = vmatprep.mubr.msk.bf16.mxu0 %vm264_vm0, %v237_v5  ;;  %v240_v13 = vpack.c.bf16 %v679_v12, %v677_v11 }
  0x14   : > { %568 = vmatmul.mubr.msk.bf16.vlgmr.msra.gmra.mrb[0].mxu0 %vm264_vm0, %v238_v9 }
  0x15   : > { %571 = vmatprep.mubr.msk.bf16.mxu0 %vm264_vm0, %v239_v10 }
  0x1c   : > { %572 = vmatmul.mubr.msk.bf16.gmra.mrb[4].mxu0 %vm264_vm0, %v240_v13 }
  0xe7   : > { %v569_v17 = vpop.f32.mrb[0].mxu0 }
  0xe8   : > { %v320_v18 = vadd.f32 %v569_v17, %v535_v16  ;;  %v311_v19 = vpop.f32.mrb[1].mxu0 }
  0xe9   : > { %v312_v20 = vadd.f32 %v535_v16, %v311_v19  ;;  %v570_v21 = vpop.f32.mrb[2].mxu0 }
  0xea   : > { %v323_v22 = vadd.f32 %v570_v21, %v535_v16  ;;  %v314_v23 = vpop.f32.mrb[3].mxu0  ;;  %v344_v25 = vmax.f32 %v320_v18, 0.0 }
  0xeb   : > { %v315_v24 = vadd.f32 %v535_v16, %v314_v23  ;;  %v342_v27 = vmax.f32 %v312_v20, 0.0 }
  0xec   : > { %v345_v26 = vmax.f32 %v323_v22, 0.0 }
  0xed   : > { %v343_v28 = vmax.f32 %v315_v24, 0.0 }
  0xee   : > { %v351_v29 = vpack.c.bf16 %v345_v26, %v344_v25 }
  0xef   : > { %v573_v30 = vpop.f32.mrb[4].mxu0  ;;  %v350_v31 = vpack.c.bf16 %v343_v28, %v342_v27 }
  0xf0   : > { %v336_v32 = vadd.f32 %v573_v30, %v535_v16  ;;  %v327_v33 = vpop.f32.mrb[5].mxu0 }
  0xf1   : > { %v328_v34 = vadd.f32 %v535_v16, %v327_v33  ;;  %v574_v35 = vpop.f32.mrb[6].mxu0  ;;  %579 = vmatprep.mubr.msk.bf16.mxu1 %vm264_vm0, %v350_v31 }
  0xf2   : > { %v339_v36 = vadd.f32 %v574_v35, %v535_v16  ;;  %v330_v37 = vpop.f32.mrb[7].mxu0  ;;  %580 = vmatmul.mubr.msk.bf16.vlgmr.msra.gmra.mrb[0].mxu1 %vm264_vm0, %v351_v29  ;;  %v348_v39 = vmax.f32 %v336_v32, 0.0 }
  0xf3   : > { %v331_v38 = vadd.f32 %v535_v16, %v330_v37  ;;  %v346_v41 = vmax.f32 %v328_v34, 0.0 }
  0xf4   : > { %v349_v40 = vmax.f32 %v339_v36, 0.0 }
  0xf5   : > { %v347_v42 = vmax.f32 %v331_v38, 0.0 }
  0xf6   : > { %v353_v43 = vpack.c.bf16 %v349_v40, %v348_v39 }
  0xf7   : > { %v352_v44 = vpack.c.bf16 %v347_v42, %v346_v41 }
  0xf9   : > { %583 = vmatprep.mubr.msk.bf16.mxu1 %vm264_vm0, %v352_v44 }
  0xfa   : > { %584 = vmatmul.mubr.msk.bf16.gmra.mrb[4].mxu1 %vm264_vm0, %v353_v43 }
 0x1c5   : > { %v581_v46 = vpop.f32.mrb[0].mxu1 }
 0x1c6   : > { %v432_v47 = vadd.f32 %v581_v46, %v542_v45  ;;  %v423_v48 = vpop.f32.mrb[1].mxu1 }
 0x1c7   : > { %v424_v49 = vadd.f32 %v542_v45, %v423_v48  ;;  %v582_v50 = vpop.f32.mrb[2].mxu1 }
 0x1c8   : > { %v456_v51 = vadd.f32 %v432_v47, %v231_v4  ;;  %v435_v52 = vadd.f32 %v582_v50, %v542_v45  ;;  %v426_v53 = vpop.f32.mrb[3].mxu1 }
 0x1c9   : > { %v454_v54 = vadd.f32 %v424_v49, %v659_v2  ;;  %v427_v55 = vadd.f32 %v542_v45, %v426_v53 }
 0x1ca   : > { %464 = vst.msk [vmem:[%s226_s14 + $0x10] sm:$0xff] %vm264_vm0, %v456_v51  ;;  %v457_v56 = vadd.f32 %v435_v52, %v665_v6 }
 0x1cb   : > { %462 = vst.msk [vmem:[%s226_s14] sm:$0xff] %vm264_vm0, %v454_v54  ;;  %v455_v57 = vadd.f32 %v427_v55, %v661_v3 }
 0x1cc   : > { %465 = vst.msk [vmem:[%s226_s14 + $0x18] sm:$0xff] %vm264_vm0, %v457_v56 }
 0x1cd   : > { %463 = vst.msk [vmem:[%s226_s14 + $0x8] sm:$0xff] %vm264_vm0, %v455_v57  ;;  %v585_v58 = vpop.f32.mrb[4].mxu1 }
 0x1ce   : > { %v448_v59 = vadd.f32 %v585_v58, %v542_v45  ;;  %v439_v60 = vpop.f32.mrb[5].mxu1 }
 0x1cf   : > { %v440_v61 = vadd.f32 %v542_v45, %v439_v60  ;;  %v586_v62 = vpop.f32.mrb[6].mxu1 }
 0x1d0   : > { %v460_v63 = vadd.f32 %v448_v59, %v677_v11  ;;  %v451_v0 = vadd.f32 %v586_v62, %v542_v45  ;;  %v442_v1 = vpop.f32.mrb[7].mxu1 }
 0x1d1   : > { %v458_v2 = vadd.f32 %v440_v61, %v667_v7  ;;  %v443_v4 = vadd.f32 %v542_v45, %v442_v1 }
 0x1d2   : > { %468 = vst.msk [vmem:[%s226_s14 + $0x30] sm:$0xff] %vm264_vm0, %v460_v63  ;;  %v461_v3 = vadd.f32 %v451_v0, %v679_v12 }
 0x1d3   : > { %466 = vst.msk [vmem:[%s226_s14 + $0x20] sm:$0xff] %vm264_vm0, %v458_v2  ;;  %v459_v5 = vadd.f32 %v443_v4, %v669_v8 }
 0x1d4   : > { %469 = vst.msk [vmem:[%s226_s14 + $0x38] sm:$0xff] %vm264_vm0, %v461_v3 }
 0x1d5   : > { %467 = vst.msk [vmem:[%s226_s14 + $0x28] sm:$0xff] %vm264_vm0, %v459_v5 }
 0x1d6 PF: > { %s15_s18 = sadd.s32 1, %s605_s18  }
 0x1d7   : > { %p12_p4 = scmp.ge.s32.totalorder %s15_s18, 4  }
 0x1d9   :  { %14 = sbr.rel (!%p12_p4) target bundleno = 1 (0x1), region = 70 }

</bundles_post_ra>
